<compile_context>
chip_gen: v6e
topology: v6e:2x2x1
jax: 0.10.0
libtpu: 0.0.40
codegen_flags: <defaults>
</compile_context>

<pallas_src>
import functools

import jax
import jax.numpy as jnp
from jax import lax
from jax.experimental import pallas as pl
from jax.experimental.pallas import tpu as pltpu

LANE_CHOICES = (512, 256, 128)        # preferred slab lane widths (x128)
TARGET_TILE_ELEMS = 2048 * 512        # ~4 MiB of f32 per input tile per step
OUT_TILE = (1, 8, 128)                # per-half partial-sum tile (lane dense)


def _mse_kernel(x_ref, t_ref, out_ref, acc_ref, *,
                rows, block_r, cols, blocks_per_half, edge_start,
                sublane_reduce):
    i = pl.program_id(0)   # half (sharded across TCs on v7x megacore)
    j = pl.program_id(1)   # row-block within the half (sequential reduction)

    @pl.when(j == 0)
    def _():
        acc_ref[...] = jnp.zeros_like(acc_ref)

    def accumulate(apply_mask):
        xv = x_ref[...].astype(jnp.float32)
        tv = t_ref[...].astype(jnp.float32)
        d = xv - tv
        if apply_mask:
            # Only ever reached for the last real (possibly partial) block or
            # the single phantom block when n_row_blocks is odd.
            logical_blk = i * blocks_per_half + j
            row0 = logical_blk * block_r
            local_row = lax.broadcasted_iota(jnp.int32, (block_r, cols), 0)
            d = jnp.where(row0 + local_row < rows, d, 0.0)
        dd = d * d
        if sublane_reduce:
            # Sublane-aligned VPU reduction into a tiny (8, cols) accumulator:
            # the reshape splits on whole (8, 128) tiles, so it is layout-free
            # and the sum is pure vreg adds (no XLU, no acc vld/vst per vreg).
            acc_ref[...] += jnp.sum(dd.reshape(block_r // 8, 8, cols), axis=0)
        else:
            # Tiny-input fallback (block_r < 8 or not a multiple of 8).
            acc_ref[...] += dd

    total_blocks = 2 * blocks_per_half
    if edge_start >= total_blocks:
        # Fully divisible, even split: no masking code emitted at all.
        accumulate(apply_mask=False)
    else:
        logical_blk = i * blocks_per_half + j
        is_edge = logical_blk >= edge_start

        @pl.when(jnp.logical_not(is_edge))
        def _():
            accumulate(apply_mask=False)

        @pl.when(is_edge)
        def _():
            accumulate(apply_mask=True)

    @pl.when(j == pl.num_programs(1) - 1)
    def _():
        s = jnp.sum(acc_ref[...])   # one cross-lane/sublane reduce per half
        out_ref[...] = jnp.full(out_ref.shape, s, dtype=out_ref.dtype)


def _mse_sum(x2, t2):
    """Sum of squared differences of two identically-shaped (rows, cols) slabs."""
    rows, cols = x2.shape

    # Row block: ~4 MiB f32 per input tile; full extent for small inputs.
    block_r = TARGET_TILE_ELEMS // cols
    if rows <= block_r:
        block_r = rows
    n_row_blocks = -(-rows // block_r)
    blocks_per_half = -(-n_row_blocks // 2)

    sublane_reduce = (block_r >= 8) and (block_r % 8 == 0)
    acc_rows = 8 if sublane_reduce else block_r

    # First logical block index that needs the masked path; if >= total blocks
    # no mask code is emitted at all.
    edge_start = (n_row_blocks - 1) if (rows % block_r != 0) else n_row_blocks

    def in_map(i, j):
        # Clamp so the auto-DMA never targets a fully out-of-bounds block; the
        # masked branch zeroes the phantom block's contribution.
        return (jnp.minimum(i * blocks_per_half + j, n_row_blocks - 1), 0)

    kernel = functools.partial(
        _mse_kernel, rows=rows, block_r=block_r, cols=cols,
        blocks_per_half=blocks_per_half, edge_start=edge_start,
        sublane_reduce=sublane_reduce)

    x_bytes = jnp.dtype(x2.dtype).itemsize
    t_bytes = jnp.dtype(t2.dtype).itemsize
    tile_elems = block_r * cols
    # 2 double-buffered input tiles + accumulator + double-buffered outputs.
    vmem_need = (2 * tile_elems * (x_bytes + t_bytes)
                 + acc_rows * cols * 4
                 + 2 * 8 * 128 * 4)
    # >= 32 MiB so v5e's 16 MiB scoped default does not force smaller tiles;
    # capped well under v7x's 64 MiB physical VMEM per TensorCore.
    vmem_limit = int(min(max(vmem_need + (4 << 20), 32 << 20), 48 << 20))

    cost = pl.CostEstimate(
        flops=3 * rows * cols,
        transcendentals=0,
        bytes_accessed=rows * cols * (x_bytes + t_bytes) + 2 * 8 * 128 * 4,
    )

    partials = pl.pallas_call(
        kernel,
        out_shape=jax.ShapeDtypeStruct((2,) + OUT_TILE[1:], jnp.float32),
        grid_spec=pltpu.PrefetchScalarGridSpec(
            num_scalar_prefetch=0,
            grid=(2, blocks_per_half),
            in_specs=[
                pl.BlockSpec((block_r, cols), in_map),
                pl.BlockSpec((block_r, cols), in_map),
            ],
            out_specs=pl.BlockSpec(OUT_TILE, lambda i, j: (i, 0, 0)),
            scratch_shapes=[pltpu.VMEM((acc_rows, cols), jnp.float32)],
        ),
        compiler_params=pltpu.CompilerParams(
            # Half axis parallel (v7x megacore shards it; sequential and
            # race-free on v5e/v6e), row-block axis is the reduction axis.
            dimension_semantics=("parallel", "arbitrary"),
            vmem_limit_bytes=vmem_limit,
        ),
        cost_estimate=cost,
    )(x2, t2)

    return partials[0, 0, 0] + partials[1, 0, 0]


def content_loss(x, target):
    """Mirrors ContentLoss.forward: returns (input_passthrough, mse_loss)."""
    assert x.shape == target.shape, "input and target must have the same shape"
    total = 1
    for s in x.shape:
        total *= int(s)

    # Lane width: prefer one that divides `total` so the 2-D slab view is a
    # free metadata reshape (no copy).
    cols = None
    for c in LANE_CHOICES:
        if total % c == 0:
            cols = c
            break

    if cols is not None:
        sum_sq = _mse_sum(x.reshape(-1, cols), target.reshape(-1, cols))
    else:
        # Ragged total: run the kernel on the 128-aligned prefix and fold the
        # (<128-element) tail in with plain JAX — no full-array pad copy.
        cols = 128
        main = (total // cols) * cols
        xf = x.reshape(-1)
        tf = target.reshape(-1)
        sum_sq = jnp.zeros((), jnp.float32)
        if main:
            sum_sq = _mse_sum(xf[:main].reshape(-1, cols),
                              tf[:main].reshape(-1, cols))
        tail = xf[main:].astype(jnp.float32) - tf[main:].astype(jnp.float32)
        sum_sq = sum_sq + jnp.sum(tail * tail)

    loss = sum_sq * (1.0 / float(total))
    # Forward returns the input unchanged (identity passthrough is glue).
    return x, loss


if __name__ == "__main__":
    key = jax.random.PRNGKey(0)
    kx, kt = jax.random.split(key)

    # NCHW, small shapes: batch=2, channels=4, spatial=16x16
    x = jax.random.normal(kx, (2, 4, 16, 16), dtype=jnp.float32)
    target = jax.random.normal(kt, (2, 4, 16, 16), dtype=jnp.float32)

    out, loss = content_loss(x, target)
    out = jax.block_until_ready(out)
    loss = jax.block_until_ready(loss)

    # Correctness check against plain-JAX reference (F.mse_loss default: mean)
    ref_loss = jnp.mean((x - target) ** 2)
    assert jnp.allclose(loss, ref_loss, rtol=1e-5, atol=1e-6), (loss, ref_loss)
    assert jnp.array_equal(out, x)

    print("KERNEL_OK")
</pallas_src>

<mosaic_0001>
module attributes {stable_mosaic.version = 11 : i64} {
  func.func @_mse_kernel(%arg0: i32, %arg1: i32, %arg2: memref<4x512xf32, #tpu.memory_space<vmem>>, %arg3: memref<4x512xf32, #tpu.memory_space<vmem>>, %arg4: memref<1x8x128xf32, #tpu.memory_space<vmem>>, %arg5: memref<4x512xf32, #tpu.memory_space<vmem>>) attributes {dimension_semantics = [#tpu.dimension_semantics<parallel>, #tpu.dimension_semantics<arbitrary>], iteration_bounds = array<i64: 2, 1>, scalar_prefetch = 0 : i64, scratch_operands = 1 : i64, tpu.core_type = #tpu.core_type<tc>, window_params = [{transform_indices = @transform_0, window_bounds = array<i64: 4, 512>}, {transform_indices = @transform_1, window_bounds = array<i64: 4, 512>}, {transform_indices = @transform_2, window_bounds = array<i64: 1, 8, 128>}]} {
    %c0_i32 = arith.constant 0 : i32
    %0 = arith.cmpi eq, %arg1, %c0_i32 : i32
    %1 = arith.extui %0 : i1 to i32
    %c0_i32_0 = arith.constant 0 : i32
    %2 = arith.cmpi ne, %1, %c0_i32_0 : i32
    scf.if %2 {
      %cst = arith.constant 0.000000e+00 : f32
      %14 = vector.broadcast %cst : f32 to vector<4x512xf32>
      %c0 = arith.constant 0 : index
      %c0_6 = arith.constant 0 : index
      %15 = vector.load %arg5[%c0, %c0_6] : memref<4x512xf32, #tpu.memory_space<vmem>>, vector<4x512xf32>
      tpu.vector_store %arg5[%c0, %c0_6], %14 {strides = array<i32>} : memref<4x512xf32, #tpu.memory_space<vmem>>, vector<4x512xf32>,
    } else {
    }
    %c1_i32 = arith.constant 1 : i32
    %3 = arith.muli %arg0, %c1_i32 : i32
    %4 = arith.addi %3, %arg1 : i32
    %c1_i32_1 = arith.constant 1 : i32
    %5 = arith.cmpi sge, %4, %c1_i32_1 : i32
    %true = arith.constant true
    %6 = arith.xori %5, %true : i1
    %7 = arith.extui %6 : i1 to i32
    %c0_i32_2 = arith.constant 0 : i32
    %8 = arith.cmpi ne, %7, %c0_i32_2 : i32
    scf.if %8 {
      %c0 = arith.constant 0 : index
      %c0_6 = arith.constant 0 : index
      %14 = vector.load %arg2[%c0, %c0_6] : memref<4x512xf32, #tpu.memory_space<vmem>>, vector<4x512xf32>
      %c0_7 = arith.constant 0 : index
      %c0_8 = arith.constant 0 : index
      %15 = vector.load %arg3[%c0_7, %c0_8] : memref<4x512xf32, #tpu.memory_space<vmem>>, vector<4x512xf32>
      %16 = arith.subf %14, %15 : vector<4x512xf32>
      %17 = arith.mulf %16, %16 : vector<4x512xf32>
      %c0_9 = arith.constant 0 : index
      %c0_10 = arith.constant 0 : index
      %18 = vector.load %arg5[%c0_9, %c0_10] : memref<4x512xf32, #tpu.memory_space<vmem>>, vector<4x512xf32>
      %19 = arith.addf %18, %17 : vector<4x512xf32>
      %c0_11 = arith.constant 0 : index
      %c0_12 = arith.constant 0 : index
      %20 = vector.load %arg5[%c0_11, %c0_12] : memref<4x512xf32, #tpu.memory_space<vmem>>, vector<4x512xf32>
      tpu.vector_store %arg5[%c0_11, %c0_12], %19 {strides = array<i32>} : memref<4x512xf32, #tpu.memory_space<vmem>>, vector<4x512xf32>,
    } else {
    }
    %9 = arith.extui %5 : i1 to i32
    %c0_i32_3 = arith.constant 0 : i32
    %10 = arith.cmpi ne, %9, %c0_i32_3 : i32
    scf.if %10 {
      %c0 = arith.constant 0 : index
      %c0_6 = arith.constant 0 : index
      %14 = vector.load %arg2[%c0, %c0_6] : memref<4x512xf32, #tpu.memory_space<vmem>>, vector<4x512xf32>
      %c0_7 = arith.constant 0 : index
      %c0_8 = arith.constant 0 : index
      %15 = vector.load %arg3[%c0_7, %c0_8] : memref<4x512xf32, #tpu.memory_space<vmem>>, vector<4x512xf32>
      %16 = arith.subf %14, %15 : vector<4x512xf32>
      %c1_i32_9 = arith.constant 1 : i32
      %17 = arith.muli %arg0, %c1_i32_9 : i32
      %18 = arith.addi %17, %arg1 : i32
      %c4_i32 = arith.constant 4 : i32
      %19 = arith.muli %18, %c4_i32 : i32
      %20 = tpu.iota {dimensions = array<i32: 0>} : vector<4x512xi32>
      %21 = vector.broadcast %19 : i32 to vector<4x512xi32>
      %22 = arith.addi %21, %20 : vector<4x512xi32>
      %c4_i32_10 = arith.constant 4 : i32
      %23 = vector.broadcast %c4_i32_10 : i32 to vector<4x512xi32>
      %24 = arith.cmpi slt, %22, %23 : vector<4x512xi32>
      %cst = arith.constant 0.000000e+00 : f32
      %25 = vector.broadcast %cst : f32 to vector<4x512xf32>
      %26 = arith.select %24, %16, %25 : vector<4x512xi1>, vector<4x512xf32>
      %27 = arith.mulf %26, %26 : vector<4x512xf32>
      %c0_11 = arith.constant 0 : index
      %c0_12 = arith.constant 0 : index
      %28 = vector.load %arg5[%c0_11, %c0_12] : memref<4x512xf32, #tpu.memory_space<vmem>>, vector<4x512xf32>
      %29 = arith.addf %28, %27 : vector<4x512xf32>
      %c0_13 = arith.constant 0 : index
      %c0_14 = arith.constant 0 : index
      %30 = vector.load %arg5[%c0_13, %c0_14] : memref<4x512xf32, #tpu.memory_space<vmem>>, vector<4x512xf32>
      tpu.vector_store %arg5[%c0_13, %c0_14], %29 {strides = array<i32>} : memref<4x512xf32, #tpu.memory_space<vmem>>, vector<4x512xf32>,
    } else {
    }
    %c0_i32_4 = arith.constant 0 : i32
    %11 = arith.cmpi eq, %arg1, %c0_i32_4 : i32
    %12 = arith.extui %11 : i1 to i32
    %c0_i32_5 = arith.constant 0 : i32
    %13 = arith.cmpi ne, %12, %c0_i32_5 : i32
    scf.if %13 {
      %c0 = arith.constant 0 : index
      %c0_6 = arith.constant 0 : index
      %14 = vector.load %arg5[%c0, %c0_6] : memref<4x512xf32, #tpu.memory_space<vmem>>, vector<4x512xf32>
      %15 = vector.shape_cast %14 : vector<4x512xf32> to vector<1x4x512xf32>
      %cst = arith.constant dense<0.000000e+00> : vector<1xf32>
      %16 = vector.multi_reduction <add>, %15, %cst [1, 2] : vector<1x4x512xf32> to vector<1xf32>
      %17 = vector.shape_cast %16 : vector<1xf32> to vector<1x1x1xf32>
      %18 = vector.extract %17[0, 0, 0] : f32 from vector<1x1x1xf32>
      %19 = vector.broadcast %18 : f32 to vector<1x8x128xf32>
      %c0_7 = arith.constant 0 : index
      %c0_8 = arith.constant 0 : index
      %c0_9 = arith.constant 0 : index
      %20 = vector.load %arg4[%c0_7, %c0_8, %c0_9] : memref<1x8x128xf32, #tpu.memory_space<vmem>>, vector<1x8x128xf32>
      tpu.vector_store %arg4[%c0_7, %c0_8, %c0_9], %19 {strides = array<i32>} : memref<1x8x128xf32, #tpu.memory_space<vmem>>, vector<1x8x128xf32>,
    } else {
    }
    return
  }
  func.func @transform_0(%arg0: i32, %arg1: i32) -> (i32, i32) {
    %c1_i32 = arith.constant 1 : i32
    %0 = arith.muli %arg0, %c1_i32 : i32
    %1 = arith.addi %0, %arg1 : i32
    %c0_i32 = arith.constant 0 : i32
    %2 = arith.minsi %1, %c0_i32 : i32
    %c0_i32_0 = arith.constant 0 : i32
    %c0_i32_1 = arith.constant 0 : i32
    return %2, %c0_i32_0 : i32, i32
  }
  func.func @transform_1(%arg0: i32, %arg1: i32) -> (i32, i32) {
    %c1_i32 = arith.constant 1 : i32
    %0 = arith.muli %arg0, %c1_i32 : i32
    %1 = arith.addi %0, %arg1 : i32
    %c0_i32 = arith.constant 0 : i32
    %2 = arith.minsi %1, %c0_i32 : i32
    %c0_i32_0 = arith.constant 0 : i32
    %c0_i32_1 = arith.constant 0 : i32
    return %2, %c0_i32_0 : i32, i32
  }
  func.func @transform_2(%arg0: i32, %arg1: i32) -> (i32, i32, i32) {
    %c0_i32 = arith.constant 0 : i32
    %c0_i32_0 = arith.constant 0 : i32
    %c0_i32_1 = arith.constant 0 : i32
    return %arg0, %c0_i32, %c0_i32_0 : i32, i32, i32
  }
}

</mosaic_0001>

<bundles_post_ra>
// kernel: tpu_custom_call.1
= control target key start
LH: loop header
LB: loop body
LE: loop exit
PB: predicated region body
PF: predicated region fallthrough
CT: control target
= control target key end

     0   :  { %7 = vsyncpa [#allocation4], 0  ;;  %s963_s0 = inlined_call_operand.hbm [shape: f32[4,512], index: 0, kind: input, shape index: {}]   ;;  %s964_s1 = inlined_call_operand.hbm [shape: f32[4,512], index: 1, kind: input, shape index: {}]   ;;  %s965_s2 = inlined_call_operand.hbm [shape: f32[2,8,128], index: 2, kind: output, shape index: {}]  }
   0x1   :  { %9 = vsyncpa [#allocation4 + $0x1], 0 }
   0x2   :  { %10 = vsyncpa [#allocation7], 0 }
   0x3   :  { %12 = vsyncpa [#allocation7 + $0x1], 0 }
   0x4   :  { %13 = vsyncpa [#allocation5], 0 }
   0x5   :  { %15 = vsyncpa [#allocation5 + $0x1], 0  ;;  %s749_s9 = smov 0   ;;  %s751_s10 = smov 0  }
   0x6   :  { %s753_s11 = smov 0   ;;  %s755_s12 = smov 0  }
   0x7   :  { %s757_s13 = smov 0   ;;  %s759_s14 = smov 0  }
   0x8   :  { %s761_s15 = smov 0   ;;  %s763_s16 = smov 0  }
   0x9 LB: > { %s448_s17 = sadd.s32 4294967295, %s728_s16   ;;  %s449_s18 = sadd.s32 4294967294, %s728_s16   ;;  %s728_s16 = sphi %s763_s16, %s21_s16   ;;  %s724_s15 = sphi %s761_s15, %s986_s15   ;;  %s720_s14 = sphi %s759_s14, %s985_s14   ;;  %s716_s13 = sphi %s757_s13, %s953_s13   ;;  %s712_s12 = sphi %s755_s12, %s984_s12   ;;  %s708_s11 = sphi %s753_s11, %s983_s11   ;;  %s704_s10 = sphi %s751_s10, %s982_s10   ;;  %s700_s9 = sphi %s749_s9, %s981_s9  }
   0xa   : > { %s33_s19 = sadd.s32 1, %s724_s15  ;;  %p697_p1 = scmp.ne.s32.totalorder %s716_s13, 0 }
   0xb   : > { %p35_p0 = scmp.ge.s32.totalorder %s33_s19, 2  ;;  %p54_p2 = scmp.eq.s32.totalorder %s728_s16, 0 }
   0xc   : > { %p59_p3 = scmp.ne.s32.totalorder %s716_s13, %s712_s12  ;;  %p60_p5 = scmp.eq.s32.totalorder %s448_s17, 0 }
   0xd   : > { %s988_s19 = smov (%p35_p0, %s33_s19), 0  ;;  %p795_p4 = por %p697_p1, %p54_p2 }
   0xe   : > { %p799_p6 = por %p60_p5, %p59_p3  ;;  %s101_s22 = ssub.s32 %s724_s15, %s988_s19 }
   0xf   : > { %p102_p7 = scmp.eq.s32.totalorder %s101_s22, 0  ;;  %s104_s23 = sadd.s32 1, %s708_s11 }
  0x10   : > { %s969_s21 = scalar_select %p799_p6, 1, 0 }
  0x11   : > { %s807_s24 = scalar_select %p102_p7, %s708_s11, %s104_s23  }
  0x12   : > { %p114_p8 = scmp.ne.s32.totalorder %s708_s11, %s704_s10  ;;  %p115_p9 = scmp.eq.s32.totalorder %s448_s17, 1 }
  0x13   : > { %p120_p10 = scmp.ne.s32.totalorder %s704_s10, %s700_s9  ;;  %p121_p11 = scmp.eq.s32.totalorder %s449_s18, 1 }
  0x14   : > { %p813_p12 = por %p115_p9, %p114_p8  ;;  %p490_p1 = scmp.lt.s32.totalorder %s728_s16, 2 }
  0x15   : > { %p818_p0 = por %p121_p11, %p120_p10  ;;  %s730_s27 = smov [#allocation3]  }
  0x16   : > { %s970_s25 = scalar_select %p813_p12, 1, 0 }
  0x17   : > { %s971_s26 = scalar_select %p818_p0, 1, 0 }
  0x18   : > { %s156_s28 = sshll.u32 %s730_s27, 4  ;;  %p825_p2 = pnand %p490_p1, %p795_p4  ;;  %s157_s28 = int_to_ptr.vmem [resolvable:$true] %s156_s28 }
  0x19   : > { %s567_s4 = scalar_lea.hbm %s963_s0, 256 }
  0x1a   : > { %p568_p7 = scmp.ne.s32.totalorder %s963_s0, %s567_s4  ;;  %p569_p8 = pneg %p825_p2 }
  0x1b   : > { %p574_p10 = scmp.lt.s32.totalorder %s567_s4, %s567_s4 }
  0x1c   : > { %p570_p4 = pnand %p569_p8, %p568_p7 }
  0x1e   : > { %p571_p9 = pneg %p570_p4 }
  0x20   : > { %p576_p11 = pnand %p574_p10, %p571_p9 }
  0x22   : > { %579 = shalt.err (!%p576_p11)
}
  0x23   : > { %s580_s7 = scalar_lea.vmem %s157_s28, 256  ;;  %s587_s8 = scalar_lea.vmem %s157_s28, 512 }
  0x24   : > { %p581_p1 = scmp.ne.s32.totalorder %s157_s28, %s580_s7  ;;  %p588_p5 = scmp.lt.s32.totalorder %s157_s28, %s157_s28 }
  0x25   : > { %p589_p0 = scmp.lt.s32.totalorder %s587_s8, %s580_s7 }
  0x26   : > { %p583_p13 = pnand %p581_p1, %p569_p8 }
  0x27   : > { %p590_p12 = por %p589_p0, %p588_p5 }
  0x28   : > { %p584_p3 = pneg %p583_p13 }
  0x2a   : > { %p591_p6 = pnand %p590_p12, %p584_p3 }
  0x2c   : > { %594 = shalt.err (!%p591_p6)
}
  0x2d   : > { %482 = dma.hbm_to_vmem [thread:$0]  (!%p825_p2), %s963_s0, 256, %s157_s28, [#allocation4]  }
  0x2e   : > { %p973_p7 = scmp.lt.s32.totalorder %s728_s16, 3  ;;  %p974_p4 = scmp.ge.s32.totalorder %s728_s16, 1 }
  0x2f   : > { %s731_s20 = smov [#allocation6]   ;;  %s595_s30 = scalar_lea.hbm %s964_s1, 256 }
  0x30   : > { %p854_p9 = pnand %p974_p4, %p973_p7  ;;  %s178_s22 = sshll.u32 %s731_s20, 4  ;;  %s179_s22 = int_to_ptr.vmem [resolvable:$true] %s178_s22 }
  0x31   : > { %p596_p6 = scmp.ne.s32.totalorder %s964_s1, %s595_s30  ;;  %p602_p0 = scmp.lt.s32.totalorder %s595_s30, %s595_s30 }
  0x32   : > { %s975_s18 = scalar_select %p854_p9, 1, 0 }
  0x33   : > { %p598_p12 = pnand %p596_p6, %p569_p8 }
  0x35   : > { %p599_p13 = pneg %p598_p12 }
  0x37   : > { %p604_p3 = pnand %p602_p0, %p599_p13 }
  0x39   : > { %607 = shalt.err (!%p604_p3)
}
  0x3a   : > { %s608_s28 = scalar_lea.vmem %s179_s22, 256  ;;  %s615_s5 = scalar_lea.vmem %s179_s22, 512 }
  0x3b   : > { %p609_p5 = scmp.ne.s32.totalorder %s179_s22, %s608_s28  ;;  %p616_p1 = scmp.lt.s32.totalorder %s179_s22, %s179_s22 }
  0x3c   : > { %p617_p7 = scmp.lt.s32.totalorder %s615_s5, %s608_s28 }
  0x3d   : > { %p611_p10 = pnand %p609_p5, %p569_p8 }
  0x3e   : > { %p618_p4 = por %p617_p7, %p616_p1 }
  0x3f   : > { %p612_p11 = pneg %p611_p10 }
  0x41   : > { %p619_p9 = pnand %p618_p4, %p612_p11 }
  0x43   : > { %622 = shalt.err (!%p619_p9)
}
  0x44   : > { %485 = dma.hbm_to_vmem [thread:$0]  (!%p825_p2), %s964_s1, 256, %s179_s22, [#allocation7]  }
  0x45   : > { %p976_p6 = scmp.ne.s32.totalorder %s975_s18, 0 }
  0x46   : > { %s189_s8 = sand.u32 (!%p976_p6), 1, %s716_s13   ;;  %p977_p8 = scmp.ne.s32.totalorder (!%p976_p6), %s969_s21, 0 }
  0x47   : > { %187 = sbr.rel (%p976_p6) target bundleno = 347 (0x15b), region = 28  ;;  %s459_s12 = sshll.u32 (!%p976_p6), %s189_s8, 4 }
  0x48   : > { %s190_s17 = scalar_lea.sflag (!%p976_p6), [#allocation4], %s189_s8  ;;  %s878_s20 = scalar_lea.vmem (!%p976_p6), [#allocation3], %s459_s12 }
  0x4c   : > { %686 = dma.done.wait (%p977_p8), %s190_s17, 256  }
  0x4d   : > { %688 = vsyncadd (%p977_p8), %s190_s17, 4294967040  ;;  %s199_s29 = scalar_lea.sflag [#allocation7], %s189_s8  ;;  %s884_s23 = scalar_lea.vmem [#allocation6], %s459_s12 }
  0x4e   : > { %690 = dma.done.wait (%p977_p8), %s199_s29, 256  }
  0x4f   : > { %692 = vsyncadd (%p977_p8), %s199_s29, 4294967040  ;;  %s225_s18 = sand.u32 1, %s704_s10   ;;  %v732_v0 = vmov 0.0   ;;  %p462_p2 = scmp.ge.s32.totalorder %s720_s14, 1 }
  0x50   : > { %s893_s22 = sshll.u32 %s225_s18, 3  ;;  %238 = vst [vmem:[#allocation2] sm:$0xff] %v732_v0  ;;  %239 = vst [vmem:[#allocation2 + $0x8] sm:$0xff] %v732_v0 }
  0x51   : > { %s227_s27 = scalar_lea.vmem [#allocation8], %s893_s22  ;;  %245 = sbr.rel (%p462_p2) target bundleno = 95 (0x5f), region = 44 }
  0x56   : > { %v246_v1 = vld [vmem:[%s878_s20] sm:$0xff]  ;;  %v247_v4 = vld [vmem:[%s878_s20 + $0x8] sm:$0xff] }
  0x57   : > { %v248_v2 = vld [vmem:[%s884_s23] sm:$0xff]  ;;  %v249_v5 = vld [vmem:[%s884_s23 + $0x8] sm:$0xff] }
  0x58   : > { %v250_v3 = vsub.f32 %v246_v1, %v248_v2  ;;  %v254_v6 = vld [vmem:[#allocation2] sm:$0xff]  ;;  %v251_v7 = vsub.f32 %v247_v4, %v249_v5  ;;  %v255_v9 = vld [vmem:[#allocation2 + $0x8] sm:$0xff] }
  0x5a   : > { %v252_v8 = vmul.f32 %v250_v3, %v250_v3  ;;  %v253_v10 = vmul.f32 %v251_v7, %v251_v7 }
  0x5c   : > { %v256_v11 = vadd.f32 %v254_v6, %v252_v8  ;;  %v257_v12 = vadd.f32 %v255_v9, %v253_v10 }
  0x5e   : > { %258 = vst [vmem:[#allocation2] sm:$0xff] %v256_v11  ;;  %259 = vst [vmem:[#allocation2 + $0x8] sm:$0xff] %v257_v12 }
  0x5f PF: > { %p463_p9 = scmp.lt.s32.totalorder %s720_s14, 1 }
  0x60   : > { %s464_s21 = sshll.u32 (!%p463_p9), %s720_s14, 2 }
  0x61   : > { %262 = sbr.rel (%p463_p9) target bundleno = 117 (0x75), region = 48 }
  0x66   : > { %v263_v13 = vld [vmem:[%s878_s20] sm:$0xff]  ;;  %v270_v15 = vlaneseq  ;;  %v272_v17 = vstv %s464_s21  ;;  %v264_v18 = vld [vmem:[%s878_s20 + $0x8] sm:$0xff] }
  0x67   : > { %v265_v14 = vld [vmem:[%s884_s23] sm:$0xff]  ;;  %v266_v19 = vld [vmem:[%s884_s23 + $0x8] sm:$0xff] }
  0x68   : > { %v267_v16 = vsub.f32 %v263_v13, %v265_v14  ;;  %v271_v20 = vshrl.u32 %v270_v15, 7  ;;  %v268_v21 = vsub.f32 %v264_v18, %v266_v19  ;;  %v289_v33 = vld [vmem:[#allocation2] sm:$0xff]  ;;  %v290_v34 = vld [vmem:[#allocation2 + $0x8] sm:$0xff] }
  0x6a   : > { %v277_v22 = vcombine.high %v267_v16, %v267_v16  ;;  %v273_v23 = vadd.s32 %v272_v17, %v271_v20  ;;  %v278_v24 = vcombine.high %v268_v21, %v268_v21 }
  0x6c   : > { %vm274_vm0 = vcmp.lt.s32.totalorder %v273_v23, 4 }
  0x6d   : > { %v281_v25 = vsel %vm274_vm0, %v267_v16, 0.0  ;;  %v282_v26 = vsel %vm274_vm0, %v277_v22, 0.0  ;;  %v283_v27 = vsel %vm274_vm0, %v268_v21, 0.0  ;;  %v284_v28 = vsel %vm274_vm0, %v278_v24, 0.0 }
  0x6e   : > { %v285_v29 = vmul.f32 %v281_v25, %v281_v25  ;;  %v286_v30 = vmul.f32 %v282_v26, %v282_v26  ;;  %v287_v31 = vmul.f32 %v283_v27, %v283_v27  ;;  %v288_v32 = vmul.f32 %v284_v28, %v284_v28 }
  0x70   : > { %v295_v35 = vcombine.low %v285_v29, %v286_v30  ;;  %v296_v36 = vcombine.low %v287_v31, %v288_v32 }
  0x72   : > { %v299_v37 = vadd.f32 %v295_v35, %v289_v33  ;;  %v300_v38 = vadd.f32 %v296_v36, %v290_v34 }
  0x74   : > { %301 = vst [vmem:[#allocation2] sm:$0xff] %v299_v37  ;;  %302 = vst [vmem:[#allocation2 + $0x8] sm:$0xff] %v300_v38 }
  0x75 PF: > { %vm314_vm1 = vcmask 1043456   ;;  %s466_s30 = sshll.u32 %s720_s14, 7  ;;  %s347_s3 = sshll.u32 %s227_s27, 4  ;;  %s348_s3 = int_to_ptr.vmem [resolvable:$true] %s347_s3 }
  0x76   : > { %s913_s5 = scalar_lea.hbm %s965_s2, %s466_s30  ;;  %s334_s7 = scalar_lea.sflag [#allocation5], %s225_s18 }
  0x77   : > { %s623_s8 = scalar_lea.vmem %s348_s3, 128  ;;  %p978_p13 = scmp.ne.s32.totalorder %s970_s25, 0 }
  0x78   : > { %p624_p12 = scmp.ne.s32.totalorder %s348_s3, %s623_s8  ;;  %s733_s14 = smov [#allocation8]  }
  0x79   : > { %s627_s12 = sshll.u32 %s733_s14, 4  ;;  %s628_s12 = int_to_ptr.vmem [resolvable:$false] %s627_s12 }
  0x7a   : > { %p625_p0 = pnand %p624_p12, %p978_p13  ;;  %s629_s17 = scalar_lea.vmem %s628_s12, 256 }
  0x7b   : > { %v306_v39 = vld [vmem:[#allocation2] sm:$0xff]  ;;  %v307_v40 = vld [vmem:[#allocation2 + $0x8] sm:$0xff]  ;;  %p630_p5 = scmp.lt.s32.totalorder %s348_s3, %s628_s12  ;;  %p631_p10 = scmp.lt.s32.totalorder %s629_s17, %s623_s8 }
  0x7c   : > { %v310_v41 = vcombine.high %v306_v39, %v306_v39  ;;  %v311_v42 = vcombine.high %v307_v40, %v307_v40  ;;  %v315_v43 = vsel %vm314_vm1, %v306_v39, 0.0  ;;  %v318_v45 = vsel %vm314_vm1, %v307_v40, 0.0  ;;  %p626_p3 = pneg %p625_p0 }
  0x7d   : > { %p632_p11 = por %p631_p10, %p630_p5 }
  0x7e   : > { %v316_v44 = vsel %vm314_vm1, %v310_v41, 0.0  ;;  %v320_v47 = vsel %vm314_vm1, %v311_v42, 0.0 }
  0x7f   : > { %v317_v46 = vadd.f32 %v316_v44, %v315_v43  ;;  %p633_p1 = pnand %p632_p11, %p626_p3 }
  0x81   : > { %v319_v48 = vadd.f32 %v318_v45, %v317_v46 }
  0x83   : > { %v321_v49 = vadd.f32 %v320_v47, %v319_v48 }
  0x85   : > { %322 = vadd.xlane.f32.xlu0 %v321_v49 }
 0x10e   : > { %v323_v50 = vpop.xlane.xlu0 %322 }
 0x10f   : > { %v324_v51 = vrot.slane %v323_v50, 4 }
 0x111   : > { %v325_v52 = vadd.f32 %v324_v51, %v323_v50 }
 0x113   : > { %v326_v53 = vrot.slane %v325_v52, 2 }
 0x115   : > { %v327_v54 = vadd.f32 %v326_v53, %v325_v52 }
 0x117   : > { %v328_v55 = vrot.slane %v327_v54, 1 }
 0x119   : > { %v329_v56 = vadd.f32 %v328_v55, %v327_v54 }
 0x11b   : > { %471 = vpush %v329_v56 }
 0x14c   : > { %s472_s6 = spop %471 }
 0x14d   : > { %v331_v57 = vstv %s472_s6 }
 0x14e   : > { %332 = vst [vmem:[%s227_s27] sm:$0xff] %v331_v57 }
 0x14f   : > { %636 = shalt.err (!%p633_p1)
}
 0x150   : > { %s637_s20 = scalar_lea.hbm %s913_s5, 128  ;;  %s641_s18 = scalar_lea.hbm %s965_s2, 256 }
 0x151   : > { %p638_p7 = scmp.ne.s32.totalorder %s913_s5, %s637_s20  ;;  %p642_p8 = scmp.lt.s32.totalorder %s913_s5, %s965_s2 }
 0x152   : > { %p643_p2 = scmp.lt.s32.totalorder %s641_s18, %s637_s20 }
 0x153   : > { %p639_p4 = pnand %p638_p7, %p978_p13 }
 0x154   : > { %p644_p9 = por %p643_p2, %p642_p8 }
 0x155   : > { %p640_p6 = pneg %p639_p4 }
 0x157   : > { %p645_p12 = pnand %p644_p9, %p640_p6 }
 0x159   : > { %648 = shalt.err (!%p645_p12)
}
 0x15a   : > { %477 = dma.vmem_to_hbm [thread:$0]  (%p978_p13), %s348_s3, 128, %s913_s5, %s334_s7  }
 0x15b PF: > { %s359_s21 = sand.u32 1, %s700_s9   ;;  %p979_p0 = scmp.ne.s32.totalorder %s971_s26, 0 }
 0x15c   : > { %p980_p3 = scmp.ge.s32.totalorder %s728_s16, 2  ;;  %s360_s30 = scalar_lea.sflag [#allocation5], %s359_s21 }
 0x15e   : > { %p487_p5 = pnand %p980_p3, %p979_p0 }
 0x160   : > { %p488_p10 = pneg %p487_p5 }
 0x162   : > { %694 = dma.done.wait (%p488_p10), %s360_s30, 128  }
 0x163   : > { %696 = vsyncadd (%p488_p10), %s360_s30, 4294967168  ;;  %s21_s16 = sadd.s32 1, %s728_s16   ;;  %s981_s9 = smov %s704_s10 }
 0x164   : > { %p18_p11 = scmp.ge.s32.totalorder %s21_s16, 4   ;;  %s982_s10 = smov %s708_s11 }
 0x165   : > { %s983_s11 = smov %s807_s24  ;;  %s984_s12 = smov %s716_s13 }
 0x166   : > { %s953_s13 = smov 0   ;;  %s985_s14 = smov %s724_s15 }
 0x167   : > { %s986_s15 = smov %s988_s19  ;;  %20 = sbr.rel (!%p18_p11) target bundleno = 9 (0x9), region = 102 }
 0x16c   :  { %365 = vsyncpa [#allocation4], 1 }
 0x16d   :  { %367 = vsyncpa [#allocation4 + $0x1], 1 }
 0x16e   :  { %368 = vsyncpa [#allocation7], 1 }
 0x16f   :  { %370 = vsyncpa [#allocation7 + $0x1], 1 }
 0x170   :  { %371 = vsyncpa [#allocation5], 1 }
 0x171   :  { %373 = vsyncpa [#allocation5 + $0x1], 1 }

</bundles_post_ra>
